<compile_context>
chip_gen: v7x
topology: tpu7x:2x2x1
jax: 0.10.0
libtpu: 0.0.40
codegen_flags: <defaults>
</compile_context>

<pallas_src>
import functools

import jax
import jax.numpy as jnp
from jax.experimental import pallas as pl
from jax.experimental.pallas import tpu as pltpu

_LANE = 128
_SUBLANE = 8


def _focal_loss_kernel(o_ref, t_ref, out_ref, acc_ref, *, rows, gamma, need_mask):
    s = pl.program_id(0)            # split index ("parallel" axis)
    i = pl.program_id(1)            # tile index within split ("arbitrary" axis)
    n_tiles = pl.num_programs(1)

    @pl.when(i == 0)
    def _init():
        acc_ref[...] = jnp.zeros_like(acc_ref)

    tr = o_ref.shape[0]

    if need_mask:
        # Global (unclamped) block index -> validity mask for rows past the
        # array end. Neutralise invalid rows BEFORE the logs:
        # o = t = 1 -> bce = 0 -> focal = 0 (never NaN from OOB garbage).
        row0 = (s * n_tiles + i) * tr
        row_ids = jax.lax.broadcasted_iota(jnp.int32, (tr, _LANE), 0)
        valid = (row0 + row_ids) < rows
        o = jnp.where(valid, o_ref[...], 1.0)
        t = jnp.where(valid, t_ref[...], 1.0)
    else:
        # Grid covers the padded array exactly; padded rows already hold 1.0.
        o = o_ref[...]
        t = t_ref[...]

    # torch.nn.BCELoss semantics: log terms clamped at -100.
    log_o = jnp.maximum(jnp.log(o), -100.0)
    log_1mo = jnp.maximum(jnp.log(1.0 - o), -100.0)
    bce = -(t * log_o + (1.0 - t) * log_1mo)
    pt = jnp.exp(-bce)
    one_m_pt = 1.0 - pt

    g = float(gamma)
    if g.is_integer() and g >= 0:        # integer gamma: unrolled multiply, no pow
        gi = int(g)
        if gi == 0:
            mod = jnp.ones_like(one_m_pt)
        else:
            mod = one_m_pt
            for _ in range(gi - 1):
                mod = mod * one_m_pt
    else:                                # general gamma: pow fallback
        mod = one_m_pt ** g
    focal = mod * bce

    # (tr,128) -> (8,128) partial sum via pure vector adds (vreg-aligned);
    # accumulate in VMEM scratch across the "arbitrary" axis.
    acc_ref[...] += jnp.sum(focal.reshape(tr // _SUBLANE, _SUBLANE, _LANE), axis=0)

    @pl.when(i == n_tiles - 1)
    def _finalize():
        out_ref[0] = acc_ref[...]


def focal_loss(outputs, targets, alpha=1.0, gamma=2.0, *,
               tile_rows=2048, num_splits=2):
    """alpha * mean((1 - exp(-bce))**gamma * bce) with torch BCELoss clamping."""
    o = outputs.reshape(-1).astype(jnp.float32)
    t = targets.reshape(-1).astype(jnp.float32)
    n = o.shape[0]

    # Pad (only if needed) to one (8,128) tile with o = t = 1.0, which contributes
    # exactly zero loss -> no mask stream required.
    pad = (-n) % (_SUBLANE * _LANE)
    if pad:
        o = jnp.pad(o, (0, pad), constant_values=1.0)
        t = jnp.pad(t, (0, pad), constant_values=1.0)
    rows = (n + pad) // _LANE

    tr = min(int(tile_rows), rows)
    tr = max(_SUBLANE, (tr // _SUBLANE) * _SUBLANE)      # multiple of 8, <= rows
    num_row_tiles = pl.cdiv(rows, tr)
    nsplit = max(1, min(int(num_splits), num_row_tiles))
    tiles_per_split = pl.cdiv(num_row_tiles, nsplit)

    # Masking is only needed if the grid over-covers the (padded) array:
    #   - the last row tile is partial, or
    #   - the last split has fewer real tiles than tiles_per_split.
    need_mask = (num_row_tiles * tr != rows) or (tiles_per_split * nsplit != num_row_tiles)

    o2 = o.reshape(rows, _LANE)
    t2 = t.reshape(rows, _LANE)

    def in_map(s, i):
        # Clamp so a trailing "extra" step of the last split re-reads a valid
        # block; its rows are fully masked in-kernel and contribute zero.
        return (jnp.minimum(s * tiles_per_split + i, num_row_tiles - 1), 0)

    kernel = functools.partial(_focal_loss_kernel, rows=rows, gamma=float(gamma),
                               need_mask=need_mask)

    partials = pl.pallas_call(
        kernel,
        out_shape=jax.ShapeDtypeStruct((nsplit, _SUBLANE, _LANE), jnp.float32),
        grid=(nsplit, tiles_per_split),
        in_specs=[
            pl.BlockSpec((tr, _LANE), in_map),
            pl.BlockSpec((tr, _LANE), in_map),
        ],
        out_specs=pl.BlockSpec((1, _SUBLANE, _LANE), lambda s, i: (s, 0, 0)),
        scratch_shapes=[pltpu.VMEM((_SUBLANE, _LANE), jnp.float32)],
        compiler_params=pltpu.CompilerParams(
            dimension_semantics=("parallel", "arbitrary"),
            vmem_limit_bytes=64 * 1024 * 1024,
        ),
        cost_estimate=pl.CostEstimate(
            flops=16 * rows * _LANE,
            transcendentals=3 * rows * _LANE,
            bytes_accessed=2 * 4 * rows * _LANE + 4 * nsplit * _SUBLANE * _LANE,
        ),
    )(o2, t2)

    total = jnp.sum(partials)
    return jnp.float32(alpha) * total / jnp.float32(n)


def _focal_loss_ref(outputs, targets, alpha=1.0, gamma=2.0):
    o = outputs.astype(jnp.float32)
    t = targets.astype(jnp.float32)
    bce = -(t * jnp.maximum(jnp.log(o), -100.0)
            + (1.0 - t) * jnp.maximum(jnp.log(1.0 - o), -100.0))
    pt = jnp.exp(-bce)
    return jnp.mean(alpha * (1.0 - pt) ** gamma * bce)


if __name__ == "__main__":
    key = jax.random.PRNGKey(0)
    k1, k2, k3, k4 = jax.random.split(key, 4)

    # Case 1: small NCHW probabilities + binary targets (module's intended use).
    shape1 = (2, 4, 16, 16)
    out1 = jax.nn.sigmoid(jax.random.normal(k1, shape1, dtype=jnp.float32))
    tgt1 = (jax.random.uniform(k2, shape1) > 0.5).astype(jnp.float32)
    loss1 = jax.block_until_ready(focal_loss(out1, tgt1, alpha=1.0, gamma=2.0))
    ref1 = jax.block_until_ready(_focal_loss_ref(out1, tgt1, alpha=1.0, gamma=2.0))
    assert jnp.allclose(loss1, ref1, rtol=1e-4, atol=1e-6), (loss1, ref1)

    # Case 2: odd element count + small tile -> exercises padding, multi-tile
    # accumulation, the 2-way split and the in-kernel OOB row masking path.
    shape2 = (3, 5, 33, 21)
    out2 = jax.nn.sigmoid(jax.random.normal(k3, shape2, dtype=jnp.float32))
    tgt2 = (jax.random.uniform(k4, shape2) > 0.5).astype(jnp.float32)
    loss2 = jax.block_until_ready(
        focal_loss(out2, tgt2, alpha=0.75, gamma=2.0, tile_rows=16))
    ref2 = jax.block_until_ready(_focal_loss_ref(out2, tgt2, alpha=0.75, gamma=2.0))
    assert jnp.allclose(loss2, ref2, rtol=1e-4, atol=1e-6), (loss2, ref2)

    # Case 3: evenly-tiled case -> exercises the no-mask fast path.
    shape3 = (4, 4, 32, 32)
    out3 = jax.nn.sigmoid(jax.random.normal(k1, shape3, dtype=jnp.float32))
    tgt3 = (jax.random.uniform(k2, shape3) > 0.5).astype(jnp.float32)
    loss3 = jax.block_until_ready(
        focal_loss(out3, tgt3, alpha=1.0, gamma=2.0, tile_rows=16, num_splits=2))
    ref3 = jax.block_until_ready(_focal_loss_ref(out3, tgt3, alpha=1.0, gamma=2.0))
    assert jnp.allclose(loss3, ref3, rtol=1e-4, atol=1e-6), (loss3, ref3)

    print("KERNEL_OK")
</pallas_src>

<mosaic_0001>
module attributes {stable_mosaic.version = 11 : i64} {
  func.func @_focal_loss_kernel(%arg0: i32, %arg1: i32, %arg2: memref<16x128xf32, #tpu.memory_space<vmem>>, %arg3: memref<16x128xf32, #tpu.memory_space<vmem>>, %arg4: memref<1x8x128xf32, #tpu.memory_space<vmem>>, %arg5: memref<8x128xf32, #tpu.memory_space<vmem>>) attributes {dimension_semantics = [#tpu.dimension_semantics<parallel>, #tpu.dimension_semantics<arbitrary>], iteration_bounds = array<i64: 1, 1>, scalar_prefetch = 0 : i64, scratch_operands = 1 : i64, tpu.core_type = #tpu.core_type<tc>, window_params = [{transform_indices = @transform_0, window_bounds = array<i64: 16, 128>}, {transform_indices = @transform_1, window_bounds = array<i64: 16, 128>}, {transform_indices = @transform_2, window_bounds = array<i64: 1, 8, 128>}]} {
    %c0_i32 = arith.constant 0 : i32
    %0 = arith.cmpi eq, %arg1, %c0_i32 : i32
    %1 = arith.extui %0 : i1 to i32
    %c0_i32_0 = arith.constant 0 : i32
    %2 = arith.cmpi ne, %1, %c0_i32_0 : i32
    scf.if %2 {
      %cst_17 = arith.constant 0.000000e+00 : f32
      %35 = vector.broadcast %cst_17 : f32 to vector<8x128xf32>
      %c0_18 = arith.constant 0 : index
      %c0_19 = arith.constant 0 : index
      %36 = vector.load %arg5[%c0_18, %c0_19] : memref<8x128xf32, #tpu.memory_space<vmem>>, vector<8x128xf32>
      tpu.vector_store %arg5[%c0_18, %c0_19], %35 {strides = array<i32>} : memref<8x128xf32, #tpu.memory_space<vmem>>, vector<8x128xf32>,
    } else {
    }
    %c0 = arith.constant 0 : index
    %c0_1 = arith.constant 0 : index
    %3 = vector.load %arg2[%c0, %c0_1] : memref<16x128xf32, #tpu.memory_space<vmem>>, vector<16x128xf32>
    %c0_2 = arith.constant 0 : index
    %c0_3 = arith.constant 0 : index
    %4 = vector.load %arg3[%c0_2, %c0_3] : memref<16x128xf32, #tpu.memory_space<vmem>>, vector<16x128xf32>
    %5 = math.log %3 : vector<16x128xf32>
    %cst = arith.constant -1.000000e+02 : f32
    %6 = vector.broadcast %cst : f32 to vector<16x128xf32>
    %7 = arith.maximumf %5, %6 : vector<16x128xf32>
    %cst_4 = arith.constant 1.000000e+00 : f32
    %8 = vector.broadcast %cst_4 : f32 to vector<16x128xf32>
    %9 = arith.subf %8, %3 : vector<16x128xf32>
    %10 = math.log %9 : vector<16x128xf32>
    %cst_5 = arith.constant -1.000000e+02 : f32
    %11 = vector.broadcast %cst_5 : f32 to vector<16x128xf32>
    %12 = arith.maximumf %10, %11 : vector<16x128xf32>
    %13 = arith.mulf %4, %7 : vector<16x128xf32>
    %cst_6 = arith.constant 1.000000e+00 : f32
    %14 = vector.broadcast %cst_6 : f32 to vector<16x128xf32>
    %15 = arith.subf %14, %4 : vector<16x128xf32>
    %16 = arith.mulf %15, %12 : vector<16x128xf32>
    %17 = arith.addf %13, %16 : vector<16x128xf32>
    %cst_7 = arith.constant 0.000000e+00 : f32
    %18 = vector.broadcast %cst_7 : f32 to vector<16x128xf32>
    %19 = arith.subf %18, %17 : vector<16x128xf32>
    %cst_8 = arith.constant 0.000000e+00 : f32
    %20 = vector.broadcast %cst_8 : f32 to vector<16x128xf32>
    %21 = arith.subf %20, %19 : vector<16x128xf32>
    %22 = math.exp %21 : vector<16x128xf32>
    %cst_9 = arith.constant 1.000000e+00 : f32
    %23 = vector.broadcast %cst_9 : f32 to vector<16x128xf32>
    %24 = arith.subf %23, %22 : vector<16x128xf32>
    %25 = arith.mulf %24, %24 : vector<16x128xf32>
    %26 = arith.mulf %25, %19 : vector<16x128xf32>
    %c0_10 = arith.constant 0 : index
    %c0_11 = arith.constant 0 : index
    %27 = vector.load %arg5[%c0_10, %c0_11] : memref<8x128xf32, #tpu.memory_space<vmem>>, vector<8x128xf32>
    %28 = vector.shape_cast %26 : vector<16x128xf32> to vector<2x8x128xf32>
    %cst_12 = arith.constant dense<0.000000e+00> : vector<8x128xf32>
    %29 = vector.multi_reduction <add>, %28, %cst_12 [0] : vector<2x8x128xf32> to vector<8x128xf32>
    %30 = arith.addf %27, %29 : vector<8x128xf32>
    %c0_13 = arith.constant 0 : index
    %c0_14 = arith.constant 0 : index
    %31 = vector.load %arg5[%c0_13, %c0_14] : memref<8x128xf32, #tpu.memory_space<vmem>>, vector<8x128xf32>
    tpu.vector_store %arg5[%c0_13, %c0_14], %30 {strides = array<i32>} : memref<8x128xf32, #tpu.memory_space<vmem>>, vector<8x128xf32>,
    %c0_i32_15 = arith.constant 0 : i32
    %32 = arith.cmpi eq, %arg1, %c0_i32_15 : i32
    %33 = arith.extui %32 : i1 to i32
    %c0_i32_16 = arith.constant 0 : i32
    %34 = arith.cmpi ne, %33, %c0_i32_16 : i32
    scf.if %34 {
      %c0_17 = arith.constant 0 : index
      %c0_18 = arith.constant 0 : index
      %35 = vector.load %arg5[%c0_17, %c0_18] : memref<8x128xf32, #tpu.memory_space<vmem>>, vector<8x128xf32>
      %c0_19 = arith.constant 0 : index
      %c0_20 = arith.constant 0 : index
      %c0_21 = arith.constant 0 : index
      %36 = vector.load %arg4[%c0_19, %c0_20, %c0_21] : memref<1x8x128xf32, #tpu.memory_space<vmem>>, vector<1x8x128xf32>
      %37 = vector.shape_cast %36 : vector<1x8x128xf32> to vector<8x128xf32>
      %38 = vector.shape_cast %35 : vector<8x128xf32> to vector<1x8x128xf32>
      tpu.vector_store %arg4[%c0_19, %c0_20, %c0_21], %38 {strides = array<i32>} : memref<1x8x128xf32, #tpu.memory_space<vmem>>, vector<1x8x128xf32>,
    } else {
    }
    return
  }
  func.func @transform_0(%arg0: i32, %arg1: i32) -> (i32, i32) {
    %c1_i32 = arith.constant 1 : i32
    %0 = arith.muli %arg0, %c1_i32 : i32
    %1 = arith.addi %0, %arg1 : i32
    %c0_i32 = arith.constant 0 : i32
    %2 = arith.minsi %1, %c0_i32 : i32
    %c0_i32_0 = arith.constant 0 : i32
    %c0_i32_1 = arith.constant 0 : i32
    return %2, %c0_i32_0 : i32, i32
  }
  func.func @transform_1(%arg0: i32, %arg1: i32) -> (i32, i32) {
    %c1_i32 = arith.constant 1 : i32
    %0 = arith.muli %arg0, %c1_i32 : i32
    %1 = arith.addi %0, %arg1 : i32
    %c0_i32 = arith.constant 0 : i32
    %2 = arith.minsi %1, %c0_i32 : i32
    %c0_i32_0 = arith.constant 0 : i32
    %c0_i32_1 = arith.constant 0 : i32
    return %2, %c0_i32_0 : i32, i32
  }
  func.func @transform_2(%arg0: i32, %arg1: i32) -> (i32, i32, i32) {
    %c0_i32 = arith.constant 0 : i32
    %c0_i32_0 = arith.constant 0 : i32
    %c0_i32_1 = arith.constant 0 : i32
    return %arg0, %c0_i32, %c0_i32_0 : i32, i32, i32
  }
}

</mosaic_0001>

<bundles_post_ra>
// kernel: tpu_custom_call.1
= control target key start
LH: loop header
LB: loop body
LE: loop exit
PB: predicated region body
PF: predicated region fallthrough
CT: control target
= control target key end

     0   :  { %7 = vsyncpa [#allocation4], 0  ;;  %s279_s0 = inlined_call_operand.hbm [shape: f32[16,128], index: 0, kind: input, shape index: {}]   ;;  %s280_s1 = inlined_call_operand.hbm [shape: f32[16,128], index: 1, kind: input, shape index: {}]   ;;  %s281_s2 = inlined_call_operand.hbm [shape: f32[1,8,128], index: 2, kind: output, shape index: {}]  }
   0x1   :  { %8 = vsyncpa [#allocation7], 0 }
   0x2   :  { %9 = vsyncpa [#allocation5], 0  ;;  %s223_s9 = smov [#allocation3]   ;;  %s151_s13 = scalar_lea.hbm %s279_s0, 256 }
   0x3   :  { %s21_s10 = sshll.u32 %s223_s9, 4  ;;  %p152_p0 = scmp.ne.s32.totalorder %s279_s0, %s151_s13  ;;  %s22_s10 = int_to_ptr.vmem [resolvable:$true] %s21_s10 }
   0x4   :  { %p155_p1 = scmp.lt.u32.totalorder %s151_s13, %s279_s0 }
   0x6   :  { %p157_p2 = pnand %p155_p1, %p152_p0 }
   0x8   :  { %160 = shalt.err (!%p157_p2)
}
   0x9   :  { %s161_s18 = scalar_lea.vmem %s22_s10, 256  ;;  %p166_p4 = scmp.lt.s32.totalorder %s22_s10, %s22_s10 }
   0xa   :  { %p162_p3 = scmp.ne.s32.totalorder %s22_s10, %s161_s18  ;;  %p167_p5 = scmp.lt.s32.totalorder %s161_s18, %s161_s18 }
   0xc   :  { %p168_p6 = por %p167_p5, %p166_p4 }
   0xe   :  { %p169_p7 = pnand %p168_p6, %p162_p3 }
  0x10   :  { %172 = shalt.err (!%p169_p7)
}
  0x11   :  { %s224_s19 = smov 128   ;;  %s225_s20 = smov 8  }
  0x12   :  { %27 = dma.hbm_to_vmem [thread:$0]  %s279_s0, 256, %s22_s10, [#allocation4], %s224_s19, %s224_s19, %s225_s20  }
  0x13   :  { %s226_s23 = smov [#allocation6]   ;;  %s173_s27 = scalar_lea.hbm %s280_s1, 256 }
  0x14   :  { %s39_s24 = sshll.u32 %s226_s23, 4  ;;  %p174_p8 = scmp.ne.s32.totalorder %s280_s1, %s173_s27  ;;  %s40_s24 = int_to_ptr.vmem [resolvable:$true] %s39_s24 }
  0x15   :  { %p177_p9 = scmp.lt.u32.totalorder %s173_s27, %s280_s1 }
  0x17   :  { %p179_p10 = pnand %p177_p9, %p174_p8 }
  0x19   :  { %182 = shalt.err (!%p179_p10)
}
  0x1a   :  { %s183_s4 = scalar_lea.vmem %s40_s24, 256  ;;  %p188_p12 = scmp.lt.s32.totalorder %s40_s24, %s40_s24 }
  0x1b   :  { %p184_p11 = scmp.ne.s32.totalorder %s40_s24, %s183_s4  ;;  %p189_p13 = scmp.lt.s32.totalorder %s183_s4, %s183_s4 }
  0x1d   :  { %p190_p0 = por %p189_p13, %p188_p12 }
  0x1f   :  { %p191_p1 = pnand %p190_p0, %p184_p11 }
  0x21   :  { %194 = shalt.err (!%p191_p1)
}
  0x22   :  { %45 = dma.hbm_to_vmem [thread:$0]  %s280_s1, 256, %s40_s24, [#allocation7], %s224_s19, %s224_s19, %s225_s20  }
  0x23   :  { %217 = dma.done.wait [#allocation4], 256  }
  0x24   :  { %218 = vsyncadd [#allocation4], 4294967040 }
  0x25   :  { %219 = dma.done.wait [#allocation7], 256  }
  0x26   :  { %220 = vsyncadd [#allocation7], 4294967040  ;;  %v65_v0 = vld [vmem:[#allocation3] sm:$0xff]  ;;  %v66_v1 = vld [vmem:[#allocation3 + $0x8] sm:$0xff]  ;;  %s227_s1 = smov [#allocation8]  }
  0x27   :  { %139 = vlog2.f32 %v65_v0  ;;  %v75_v2 = vsub.f32 1.0, %v65_v0  ;;  %v76_v3 = vsub.f32 1.0, %v66_v1  ;;  %v67_v5 = vld [vmem:[#allocation6] sm:$0xff]  ;;  %v68_v7 = vld [vmem:[#allocation6 + $0x8] sm:$0xff]  ;;  %s120_s6 = sshll.u32 %s227_s1, 4  ;;  %s121_s6 = int_to_ptr.vmem [resolvable:$true] %s120_s6 }
  0x28   :  { %141 = vlog2.f32 %v66_v1  ;;  %v85_v14 = vsub.f32 1.0, %v67_v5  ;;  %v86_v17 = vsub.f32 1.0, %v68_v7  ;;  %s195_s7 = scalar_lea.vmem %s121_s6, 128  ;;  %p200_p3 = scmp.lt.s32.totalorder %s121_s6, %s121_s6 }
  0x29   :  { %143 = vlog2.f32 %v75_v2  ;;  %p196_p2 = scmp.ne.s32.totalorder %s121_s6, %s195_s7  ;;  %p201_p4 = scmp.lt.s32.totalorder %s195_s7, %s195_s7 }
  0x2a   :  { %145 = vlog2.f32 %v76_v3 }
  0x2b   :  { %p202_p5 = por %p201_p4, %p200_p3 }
  0x2d   :  { %p203_p6 = pnand %p202_p5, %p196_p2 }
  0x31   :  { %v140_v4 = vpop.eup %139 }
  0x32   :  { %v142_v6 = vpop.eup %141  ;;  %v70_v8 = vmul.f32 0.6931472, %v140_v4 }
  0x33   :  { %v144_v9 = vpop.eup %143  ;;  %v72_v10 = vmul.f32 0.6931472, %v142_v6 }
  0x34   :  { %v146_v11 = vpop.eup %145  ;;  %v73_v12 = vmax.f32 %v70_v8, -100.0  ;;  %v78_v13 = vmul.f32 0.6931472, %v144_v9 }
  0x35   :  { %v74_v15 = vmax.f32 %v72_v10, -100.0  ;;  %v80_v16 = vmul.f32 0.6931472, %v146_v11 }
  0x36   :  { %v81_v18 = vmax.f32 %v78_v13, -100.0  ;;  %v83_v19 = vmul.f32 %v73_v12, %v67_v5 }
  0x37   :  { %v82_v20 = vmax.f32 %v80_v16, -100.0  ;;  %v84_v21 = vmul.f32 %v74_v15, %v68_v7 }
  0x38   :  { %v87_v22 = vmul.f32 %v85_v14, %v81_v18 }
  0x39   :  { %v88_v23 = vmul.f32 %v86_v17, %v82_v20 }
  0x3a   :  { %v89_v24 = vadd.f32 %v87_v22, %v83_v19 }
  0x3b   :  { %v90_v25 = vadd.f32 %v88_v23, %v84_v21 }
  0x3c   :  { %v91_v26 = vsub.f32 0.0, %v89_v24 }
  0x3d   :  { %v92_v27 = vsub.f32 0.0, %v90_v25 }
  0x3e   :  { %v93_v28 = vsub.f32 0.0, %v91_v26 }
  0x3f   :  { %v94_v29 = vsub.f32 0.0, %v92_v27 }
  0x40   :  { %v95_v30 = vmul.f32 1.442695, %v93_v28 }
  0x41   :  { %v97_v31 = vmul.f32 1.442695, %v94_v29 }
  0x42   :  { %147 = vpow2.f32 %v95_v30 }
  0x43   :  { %149 = vpow2.f32 %v97_v31 }
  0x4c   :  { %v148_v32 = vpop.eup %147 }
  0x4d   :  { %v150_v33 = vpop.eup %149  ;;  %v99_v34 = vsub.f32 1.0, %v148_v32 }
  0x4e   :  { %v100_v35 = vsub.f32 1.0, %v150_v33 }
  0x4f   :  { %v101_v36 = vmul.f32 %v99_v34, %v99_v34 }
  0x50   :  { %v102_v37 = vmul.f32 %v100_v35, %v100_v35 }
  0x51   :  { %v103_v38 = vmul.f32 %v101_v36, %v91_v26 }
  0x52   :  { %v104_v39 = vmul.f32 %v102_v37, %v92_v27 }
  0x54   :  { %v106_v40 = vadd.f32 %v104_v39, %v103_v38 }
  0x56   :  { %113 = vst [vmem:[#allocation8] sm:$0xff] %v106_v40 }
  0x57   :  { %206 = shalt.err (!%p203_p6)
}
  0x58   :  { %s207_s10 = scalar_lea.hbm %s281_s2, 128 }
  0x59   :  { %p208_p7 = scmp.ne.s32.totalorder %s281_s2, %s207_s10  ;;  %p211_p8 = scmp.lt.u32.totalorder %s207_s10, %s281_s2 }
  0x5b   :  { %p213_p9 = pnand %p211_p8, %p208_p7 }
  0x5d   :  { %216 = shalt.err (!%p213_p9)
}
  0x5e   :  { %123 = dma.vmem_to_hbm [thread:$0]  %s121_s6, 128, %s281_s2, [#allocation5]  }
  0x5f   :  { %221 = dma.done.wait [#allocation5], 128  }
  0x60   :  { %222 = vsyncadd [#allocation5], 4294967168 }
  0x61   :  { %127 = vsyncpa [#allocation4], 1 }
  0x62   :  { %128 = vsyncpa [#allocation7], 1 }
  0x63   :  { %129 = vsyncpa [#allocation5], 1 }

</bundles_post_ra>
